<compile_context>
chip_gen: v5e
topology: v5e:2x2
jax: 0.10.0
libtpu: 0.0.40
codegen_flags: <defaults>
</compile_context>

<pallas_src>
import math

import jax
import jax.numpy as jnp
from jax.experimental import pallas as pl
from jax.experimental.pallas import tpu as pltpu

DIM_FEATURE = 310
H1, H2, H3 = 256, 128, 64
NEG_SLOPE = 0.01

DEFAULT_MAX_TB = 1024        # cap on the batch tile (multiple of 256)
TARGET_GRID_STEPS = 4        # >=2 so v7x megacore can shard; >2 helps pipelining
VMEM_LIMIT_BYTES = 32 * 1024 * 1024


def _round_up(x, m):
    return ((x + m - 1) // m) * m


def _leaky_relu(x):
    return jnp.where(x > 0, x, NEG_SLOPE * x)


def cfe_kernel(x_ref, w1_ref, b1_ref, w2_ref, b2_ref, w3_ref, b3_ref, o_ref):
    """One batch tile: three fused (dot + bias + LeakyReLU) layers.

    Matmuls run on the MXU in the weights' dtype (bf16 by default) with f32
    accumulation; the activation cast happens here (cheap VPU pack hidden under
    MXU/DMA work) so x travels HBM->VMEM exactly once in its native dtype.
    Bias-add and LeakyReLU stay in f32 on the VPU (v5e has no bf16 VPU path).
    """
    mxu_dtype = w1_ref.dtype

    # Layer 1: (tb, 310) @ (310, 256) + (1, 256)
    x = x_ref[...].astype(mxu_dtype)
    h = jnp.dot(x, w1_ref[...], preferred_element_type=jnp.float32)
    h = _leaky_relu(h + b1_ref[...])

    # Layer 2: (tb, 256) @ (256, 128) + (1, 128)
    h = jnp.dot(h.astype(mxu_dtype), w2_ref[...],
                preferred_element_type=jnp.float32)
    h = _leaky_relu(h + b2_ref[...])

    # Layer 3: (tb, 128) @ (128, 64) + (1, 64)
    h = jnp.dot(h.astype(mxu_dtype), w3_ref[...],
                preferred_element_type=jnp.float32)
    h = _leaky_relu(h + b3_ref[...])

    o_ref[...] = h.astype(o_ref.dtype)


def _choose_tb(B, align):
    """Batch tile: aligned, capped, and sized so the grid gets multiple steps."""
    B_al = _round_up(B, align)
    tb = _round_up(pl.cdiv(B_al, TARGET_GRID_STEPS), align)
    return max(align, min(tb, DEFAULT_MAX_TB))


def cfe_forward(x, params, *, tb=None, use_bf16=True, out_dtype=None):
    """x: (B, 310). params: dict of w1,b1,w2,b2,w3,b3. Returns (B, 64)."""
    B, F = x.shape
    assert F == DIM_FEATURE, F
    out_dtype = out_dtype if out_dtype is not None else x.dtype
    mxu_dtype = jnp.bfloat16 if use_bf16 else x.dtype

    # bf16 min sublane tile is 16 rows; f32 is 8.
    align = 16 if use_bf16 else 8
    if tb is None:
        tb = _choose_tb(B, align)
    tb = max(align, _round_up(int(tb), align))
    B_pad = _round_up(B, tb)
    if B_pad != B:
        x = jnp.pad(x, ((0, B_pad - B), (0, 0)))

    # No-ops when params were prepared once via prepare_params().
    w1 = params["w1"].astype(mxu_dtype)
    w2 = params["w2"].astype(mxu_dtype)
    w3 = params["w3"].astype(mxu_dtype)
    b1 = params["b1"].astype(jnp.float32)
    b2 = params["b2"].astype(jnp.float32)
    b3 = params["b3"].astype(jnp.float32)

    grid = (B_pad // tb,)

    def const_spec(shape):
        # Constant index_map -> DMA'd once, resident across the batch grid.
        return pl.BlockSpec(shape, lambda i: (0, 0))

    out = pl.pallas_call(
        cfe_kernel,
        out_shape=jax.ShapeDtypeStruct((B_pad, H3), out_dtype),
        grid_spec=pltpu.PrefetchScalarGridSpec(
            num_scalar_prefetch=0,
            grid=grid,
            in_specs=[
                pl.BlockSpec((tb, F), lambda i: (i, 0)),   # x tile (pipelined)
                const_spec((F, H1)),                       # w1
                const_spec((1, H1)),                       # b1
                const_spec((H1, H2)),                      # w2
                const_spec((1, H2)),                       # b2
                const_spec((H2, H3)),                      # w3
                const_spec((1, H3)),                       # b3
            ],
            out_specs=pl.BlockSpec((tb, H3), lambda i: (i, 0)),
        ),
        compiler_params=pltpu.CompilerParams(
            dimension_semantics=("parallel",),
            vmem_limit_bytes=VMEM_LIMIT_BYTES,
        ),
    )(x, w1, b1, w2, b2, w3, b3)

    return out[:B] if B_pad != B else out


def init_params(key):
    """Deterministic init mimicking torch.nn.Linear defaults
    (uniform(-1/sqrt(fan_in), 1/sqrt(fan_in)) for weight and bias)."""
    keys = jax.random.split(key, 6)

    def lin(kw, kb, fan_in, fan_out):
        bound = 1.0 / math.sqrt(fan_in)
        w = jax.random.uniform(kw, (fan_in, fan_out), jnp.float32, -bound, bound)
        b = jax.random.uniform(kb, (1, fan_out), jnp.float32, -bound, bound)
        return w, b

    w1, b1 = lin(keys[0], keys[1], DIM_FEATURE, H1)
    w2, b2 = lin(keys[2], keys[3], H1, H2)
    w3, b3 = lin(keys[4], keys[5], H2, H3)
    return {"w1": w1, "b1": b1, "w2": w2, "b2": b2, "w3": w3, "b3": b3}


def prepare_params(params, *, use_bf16=True):
    """One-time cast of the params (weights -> MXU dtype, biases -> f32) so the
    per-call path carries no cast traffic."""
    mxu_dtype = jnp.bfloat16 if use_bf16 else jnp.float32
    return {
        "w1": params["w1"].astype(mxu_dtype),
        "w2": params["w2"].astype(mxu_dtype),
        "w3": params["w3"].astype(mxu_dtype),
        "b1": params["b1"].astype(jnp.float32),
        "b2": params["b2"].astype(jnp.float32),
        "b3": params["b3"].astype(jnp.float32),
    }


def cfe_reference(x, p):
    h = jnp.dot(x, p["w1"].astype(jnp.float32)) + p["b1"]
    h = jnp.where(h > 0, h, NEG_SLOPE * h)
    h = jnp.dot(h, p["w2"].astype(jnp.float32)) + p["b2"]
    h = jnp.where(h > 0, h, NEG_SLOPE * h)
    h = jnp.dot(h, p["w3"].astype(jnp.float32)) + p["b3"]
    h = jnp.where(h > 0, h, NEG_SLOPE * h)
    return h


def cfe_reference_bf16(x, p):
    bf = jnp.bfloat16
    h = jnp.dot(x.astype(bf), p["w1"].astype(bf),
                preferred_element_type=jnp.float32) + p["b1"]
    h = jnp.where(h > 0, h, NEG_SLOPE * h)
    h = jnp.dot(h.astype(bf), p["w2"].astype(bf),
                preferred_element_type=jnp.float32) + p["b2"]
    h = jnp.where(h > 0, h, NEG_SLOPE * h)
    h = jnp.dot(h.astype(bf), p["w3"].astype(bf),
                preferred_element_type=jnp.float32) + p["b3"]
    h = jnp.where(h > 0, h, NEG_SLOPE * h)
    return h


if __name__ == "__main__":
    key = jax.random.PRNGKey(0)
    kx1, kx2, kx3, kp = jax.random.split(key, 4)
    raw_params = init_params(kp)

    # 1) Exact f32 path (small batch, single grid step) vs f32 reference.
    params_f32 = prepare_params(raw_params, use_bf16=False)
    x_a = jax.random.normal(kx1, (16, DIM_FEATURE), dtype=jnp.float32)
    out_a = jax.block_until_ready(cfe_forward(x_a, params_f32, use_bf16=False))
    ref_a = cfe_reference(x_a, raw_params)
    assert out_a.shape == (16, H3), out_a.shape
    assert jnp.allclose(out_a, ref_a, atol=1e-4, rtol=1e-4), "f32 mismatch"

    # 2) bf16-MXU path with a non-divisible batch (exercises padding) and the
    #    16-row tile so the grid has multiple pipelined steps.
    params_bf16 = prepare_params(raw_params, use_bf16=True)
    x_b = jax.random.normal(kx2, (20, DIM_FEATURE), dtype=jnp.float32)
    out_b = jax.block_until_ready(
        cfe_forward(x_b, params_bf16, tb=16, use_bf16=True))
    ref_b = cfe_reference_bf16(x_b, raw_params)
    assert out_b.shape == (20, H3), out_b.shape
    assert jnp.allclose(out_b, ref_b, atol=2e-2, rtol=2e-2), "bf16 mismatch"

    # 3) bf16 path with auto tile selection: B=200 -> tb=64, 4 grid steps
    #    (megacore-shaped grid), padded batch sliced back off.
    x_c = jax.random.normal(kx3, (200, DIM_FEATURE), dtype=jnp.float32)
    out_c = jax.block_until_ready(cfe_forward(x_c, params_bf16, use_bf16=True))
    ref_c = cfe_reference_bf16(x_c, raw_params)
    assert out_c.shape == (200, H3), out_c.shape
    assert jnp.allclose(out_c, ref_c, atol=2e-2, rtol=2e-2), "bf16 auto-tile mismatch"

    print("KERNEL_OK")
</pallas_src>

<mosaic_0001>
module attributes {stable_mosaic.version = 11 : i64} {
  func.func @cfe_kernel(%arg0: i32, %arg1: memref<8x310xf32, #tpu.memory_space<vmem>>, %arg2: memref<310x256xf32, #tpu.memory_space<vmem>>, %arg3: memref<1x256xf32, #tpu.memory_space<vmem>>, %arg4: memref<256x128xf32, #tpu.memory_space<vmem>>, %arg5: memref<1x128xf32, #tpu.memory_space<vmem>>, %arg6: memref<128x64xf32, #tpu.memory_space<vmem>>, %arg7: memref<1x64xf32, #tpu.memory_space<vmem>>, %arg8: memref<8x64xf32, #tpu.memory_space<vmem>>) attributes {dimension_semantics = [#tpu.dimension_semantics<parallel>], iteration_bounds = array<i64: 2>, scalar_prefetch = 0 : i64, scratch_operands = 0 : i64, tpu.core_type = #tpu.core_type<tc>, window_params = [{transform_indices = @transform_0, window_bounds = array<i64: 8, 310>}, {pipeline_mode = #tpu.pipeline_mode<synchronous>, transform_indices = @transform_1, window_bounds = array<i64: 310, 256>}, {pipeline_mode = #tpu.pipeline_mode<synchronous>, transform_indices = @transform_2, window_bounds = array<i64: 1, 256>}, {pipeline_mode = #tpu.pipeline_mode<synchronous>, transform_indices = @transform_3, window_bounds = array<i64: 256, 128>}, {pipeline_mode = #tpu.pipeline_mode<synchronous>, transform_indices = @transform_4, window_bounds = array<i64: 1, 128>}, {pipeline_mode = #tpu.pipeline_mode<synchronous>, transform_indices = @transform_5, window_bounds = array<i64: 128, 64>}, {pipeline_mode = #tpu.pipeline_mode<synchronous>, transform_indices = @transform_6, window_bounds = array<i64: 1, 64>}, {transform_indices = @transform_7, window_bounds = array<i64: 8, 64>}]} {
    %c0 = arith.constant 0 : index
    %c0_0 = arith.constant 0 : index
    %0 = vector.load %arg1[%c0, %c0_0] : memref<8x310xf32, #tpu.memory_space<vmem>>, vector<8x310xf32>
    %c0_1 = arith.constant 0 : index
    %c0_2 = arith.constant 0 : index
    %1 = vector.load %arg2[%c0_1, %c0_2] : memref<310x256xf32, #tpu.memory_space<vmem>>, vector<310x256xf32>
    %cst = arith.constant dense<0.000000e+00> : vector<8x256xf32>
    %2 = tpu.matmul %0, %1, %cst {dimension_numbers = #tpu.dot_dimension_numbers<[1], [0], [0], [1], [0, 0, 1, 1], [], []>} : vector<8x310xf32>, vector<310x256xf32>, vector<8x256xf32> -> vector<8x256xf32>
    %c0_3 = arith.constant 0 : index
    %c0_4 = arith.constant 0 : index
    %3 = vector.load %arg3[%c0_3, %c0_4] : memref<1x256xf32, #tpu.memory_space<vmem>>, vector<1x256xf32>
    %4 = vector.broadcast %3 : vector<1x256xf32> to vector<8x256xf32>
    %5 = arith.addf %2, %4 : vector<8x256xf32>
    %cst_5 = arith.constant 0.000000e+00 : f32
    %6 = vector.broadcast %cst_5 : f32 to vector<8x256xf32>
    %7 = arith.cmpf ogt, %5, %6 : vector<8x256xf32>
    %cst_6 = arith.constant 0.00999999977 : f32
    %8 = vector.broadcast %cst_6 : f32 to vector<8x256xf32>
    %9 = arith.mulf %8, %5 : vector<8x256xf32>
    %10 = arith.select %7, %5, %9 : vector<8x256xi1>, vector<8x256xf32>
    %c0_7 = arith.constant 0 : index
    %c0_8 = arith.constant 0 : index
    %11 = vector.load %arg4[%c0_7, %c0_8] : memref<256x128xf32, #tpu.memory_space<vmem>>, vector<256x128xf32>
    %cst_9 = arith.constant dense<0.000000e+00> : vector<8x128xf32>
    %12 = tpu.matmul %10, %11, %cst_9 {dimension_numbers = #tpu.dot_dimension_numbers<[1], [0], [0], [1], [0, 0, 1, 1], [], []>} : vector<8x256xf32>, vector<256x128xf32>, vector<8x128xf32> -> vector<8x128xf32>
    %c0_10 = arith.constant 0 : index
    %c0_11 = arith.constant 0 : index
    %13 = vector.load %arg5[%c0_10, %c0_11] : memref<1x128xf32, #tpu.memory_space<vmem>>, vector<1x128xf32>
    %14 = vector.broadcast %13 : vector<1x128xf32> to vector<8x128xf32>
    %15 = arith.addf %12, %14 : vector<8x128xf32>
    %cst_12 = arith.constant 0.000000e+00 : f32
    %16 = vector.broadcast %cst_12 : f32 to vector<8x128xf32>
    %17 = arith.cmpf ogt, %15, %16 : vector<8x128xf32>
    %cst_13 = arith.constant 0.00999999977 : f32
    %18 = vector.broadcast %cst_13 : f32 to vector<8x128xf32>
    %19 = arith.mulf %18, %15 : vector<8x128xf32>
    %20 = arith.select %17, %15, %19 : vector<8x128xi1>, vector<8x128xf32>
    %c0_14 = arith.constant 0 : index
    %c0_15 = arith.constant 0 : index
    %21 = vector.load %arg6[%c0_14, %c0_15] : memref<128x64xf32, #tpu.memory_space<vmem>>, vector<128x64xf32>
    %cst_16 = arith.constant dense<0.000000e+00> : vector<8x64xf32>
    %22 = tpu.matmul %20, %21, %cst_16 {dimension_numbers = #tpu.dot_dimension_numbers<[1], [0], [0], [1], [0, 0, 1, 1], [], []>} : vector<8x128xf32>, vector<128x64xf32>, vector<8x64xf32> -> vector<8x64xf32>
    %c0_17 = arith.constant 0 : index
    %c0_18 = arith.constant 0 : index
    %23 = vector.load %arg7[%c0_17, %c0_18] : memref<1x64xf32, #tpu.memory_space<vmem>>, vector<1x64xf32>
    %24 = vector.broadcast %23 : vector<1x64xf32> to vector<8x64xf32>
    %25 = arith.addf %22, %24 : vector<8x64xf32>
    %cst_19 = arith.constant 0.000000e+00 : f32
    %26 = vector.broadcast %cst_19 : f32 to vector<8x64xf32>
    %27 = arith.cmpf ogt, %25, %26 : vector<8x64xf32>
    %cst_20 = arith.constant 0.00999999977 : f32
    %28 = vector.broadcast %cst_20 : f32 to vector<8x64xf32>
    %29 = arith.mulf %28, %25 : vector<8x64xf32>
    %30 = arith.select %27, %25, %29 : vector<8x64xi1>, vector<8x64xf32>
    %c0_21 = arith.constant 0 : index
    %c0_22 = arith.constant 0 : index
    %31 = vector.load %arg8[%c0_21, %c0_22] : memref<8x64xf32, #tpu.memory_space<vmem>>, vector<8x64xf32>
    tpu.vector_store %arg8[%c0_21, %c0_22], %30 {strides = array<i32>} : memref<8x64xf32, #tpu.memory_space<vmem>>, vector<8x64xf32>,
    return
  }
  func.func @transform_0(%arg0: i32) -> (i32, i32) {
    %c0_i32 = arith.constant 0 : i32
    %c0_i32_0 = arith.constant 0 : i32
    return %arg0, %c0_i32 : i32, i32
  }
  func.func @transform_1(%arg0: i32) -> (i32, i32) {
    %c0_i32 = arith.constant 0 : i32
    %c0_i32_0 = arith.constant 0 : i32
    %c0_i32_1 = arith.constant 0 : i32
    return %c0_i32, %c0_i32_0 : i32, i32
  }
  func.func @transform_2(%arg0: i32) -> (i32, i32) {
    %c0_i32 = arith.constant 0 : i32
    %c0_i32_0 = arith.constant 0 : i32
    %c0_i32_1 = arith.constant 0 : i32
    return %c0_i32, %c0_i32_0 : i32, i32
  }
  func.func @transform_3(%arg0: i32) -> (i32, i32) {
    %c0_i32 = arith.constant 0 : i32
    %c0_i32_0 = arith.constant 0 : i32
    %c0_i32_1 = arith.constant 0 : i32
    return %c0_i32, %c0_i32_0 : i32, i32
  }
  func.func @transform_4(%arg0: i32) -> (i32, i32) {
    %c0_i32 = arith.constant 0 : i32
    %c0_i32_0 = arith.constant 0 : i32
    %c0_i32_1 = arith.constant 0 : i32
    return %c0_i32, %c0_i32_0 : i32, i32
  }
  func.func @transform_5(%arg0: i32) -> (i32, i32) {
    %c0_i32 = arith.constant 0 : i32
    %c0_i32_0 = arith.constant 0 : i32
    %c0_i32_1 = arith.constant 0 : i32
    return %c0_i32, %c0_i32_0 : i32, i32
  }
  func.func @transform_6(%arg0: i32) -> (i32, i32) {
    %c0_i32 = arith.constant 0 : i32
    %c0_i32_0 = arith.constant 0 : i32
    %c0_i32_1 = arith.constant 0 : i32
    return %c0_i32, %c0_i32_0 : i32, i32
  }
  func.func @transform_7(%arg0: i32) -> (i32, i32) {
    %c0_i32 = arith.constant 0 : i32
    %c0_i32_0 = arith.constant 0 : i32
    return %arg0, %c0_i32 : i32, i32
  }
}

</mosaic_0001>

<bundles_post_ra>
// kernel: tpu_custom_call.1
= control target key start
LH: loop header
LB: loop body
LE: loop exit
PB: predicated region body
PF: predicated region fallthrough
CT: control target
= control target key end

     0   :  { %12 = vsyncpa [#allocation3], 0  ;;  %s1199_s0 = inlined_call_operand.vmem [shape: f32[16,310], index: 0, kind: input, shape index: {}]   ;;  %s1200_s1 = inlined_call_operand.hbm [shape: f32[310,256], index: 1, kind: input, shape index: {}]   ;;  %s1201_s2 = inlined_call_operand.vmem [shape: f32[1,256], index: 2, kind: input, shape index: {}]   ;;  %s1202_s3 = inlined_call_operand.hbm [shape: f32[256,128], index: 3, kind: input, shape index: {}]   ;;  %s1203_s4 = inlined_call_operand.vmem [shape: f32[1,128], index: 4, kind: input, shape index: {}]   ;;  %s1204_s5 = inlined_call_operand.vmem [shape: f32[128,64], index: 5, kind: input, shape index: {}]   ;;  %s1205_s6 = inlined_call_operand.vmem [shape: f32[1,64], index: 6, kind: input, shape index: {}]   ;;  %s1206_s7 = inlined_call_operand.hbm [shape: f32[16,64], index: 7, kind: output, shape index: {}]  }
   0x1   :  { %13 = vsyncpa [#allocation6], 0 }
   0x2   :  { %14 = vsyncpa [#allocation4], 0 }
   0x3   :  { %16 = vsyncpa [#allocation4 + $0x1], 0  ;;  %s1019_s24 = smov 0   ;;  %s1021_s25 = smov 0  }
   0x4   :  { %s1023_s26 = smov 0   ;;  %s1025_s27 = smov 0  }
   0x5 LB: > { %s1040_s28 = sadd.s32 4294967295, %s971_s27   ;;  %s756_s29 = sadd.s32 4294967294, %s971_s27   ;;  %s971_s27 = sphi %s1025_s27, %s1213_s27   ;;  %s967_s26 = sphi %s1023_s26, %s1212_s26   ;;  %s963_s25 = sphi %s1021_s25, %s1211_s25   ;;  %s959_s24 = sphi %s1019_s24, %s1210_s24  }
   0x6   : > { %s1044_s30 = sadd.s32 1, %s971_s27   ;;  %s181_s8 = sadd.s32 1, %s967_s26 }
   0x7   : > { %s178_s9 = ssub.s32 %s971_s27, %s1044_s30  ;;  %p191_p0 = scmp.ne.s32.totalorder %s967_s26, %s963_s25 }
   0x8   : > { %p179_p1 = scmp.eq.s32.totalorder %s178_s9, 0  ;;  %p192_p2 = scmp.eq.s32.totalorder %s1040_s28, 1 }
   0x9   : > { %p197_p3 = scmp.ne.s32.totalorder %s963_s25, %s959_s24  ;;  %p198_p4 = scmp.eq.s32.totalorder %s756_s29, 1 }
   0xa   : > { %s1055_s10 = scalar_select %p179_p1, %s967_s26, %s181_s8  }
   0xb   : > { %p1057_p5 = por %p192_p2, %p191_p0  ;;  %p1061_p6 = por %p198_p4, %p197_p3 }
   0xc   : > { %p757_p7 = scmp.ge.s32.totalorder %s971_s27, 1  ;;  %p205_p8 = scmp.lt.s32.totalorder %s971_s27, 3 }
   0xd   : > { %p796_p9 = scmp.eq.s32.totalorder %s1040_s28, 0  ;;  %s216_s16 = sshll.u32 %s1200_s1, 4  ;;  %s217_s16 = int_to_ptr.hbm [resolvable:$true] %s216_s16 }
   0xe   : > { %p1068_p10 = pnand %p757_p7, %p205_p8  ;;  %s973_s17 = smov [#allocation2]  }
   0xf   : > { %s218_s18 = sshll.u32 %s973_s17, 4  ;;  %s233_s21 = sshll.u32 %s1202_s3, 4  ;;  %s219_s18 = int_to_ptr.vmem [resolvable:$true] %s218_s18  ;;  %s234_s21 = int_to_ptr.hbm [resolvable:$true] %s233_s21 }
  0x10   : > { %p785_p11 = pneg %p1068_p10  ;;  %s974_s22 = smov 256  }
  0x11   : > { %s975_s23 = smov 16   ;;  %s976_s29 = smov [#allocation5]  }
  0x12   : > { %p786_p12 = pnand %p796_p9, %p785_p11  ;;  %s235_s8 = sshll.u32 %s976_s29, 4  ;;  %s236_s8 = int_to_ptr.vmem [resolvable:$true] %s235_s8 }
  0x13   : > { %s977_s9 = smov 128   ;;  %s978_s14 = smov 8  }
  0x14   : > { %788 = dma.hbm_to_vmem [thread:$0]  (!%p786_p12), %s217_s16, 9984, %s219_s18, [#allocation3], %s974_s22, %s974_s22, %s975_s23  }
  0x15   : > { %791 = dma.hbm_to_vmem [thread:$0]  (!%p786_p12), %s234_s21, 4096, %s236_s8, [#allocation6], %s977_s9, %s977_s9, %s978_s14  }
  0x16   : > { %268 = sbr.rel (%p1068_p10) target bundleno = 498 (0x1f2), region = 48 }
  0x1b   : > { %946 = dma.done.wait (%p796_p9), [#allocation3], 9984  }
  0x1c   : > { %948 = vsyncadd (%p796_p9), [#allocation3], 4294957312 }
  0x1d   : > { %950 = dma.done.wait (%p796_p9), [#allocation6], 4096  }
  0x1e   : > { %952 = vsyncadd (%p796_p9), [#allocation6], 4294963200  ;;  %vm402_vm0 = vcmask 1045504   ;;  %v390_v0 = vld [vmem:[#allocation2 + $0x260] sm:$0x3f]  ;;  %v388_v1 = vld [vmem:[#allocation2 + $0x250] sm:$0xff] }
  0x1f   : > { %766 = vmatpush.msk.msra.mxu2 %vm402_vm0, %v390_v0  ;;  %v344_v2 = vld [vmem:[#allocation2 + $0xf0] sm:$0xff]  ;;  %v386_v3 = vld [vmem:[#allocation2 + $0x240] sm:$0xff]  ;;  %v345_v11 = vld [vmem:[#allocation2 + $0xf8] sm:$0xff]  ;;  %p306_p13 = scmp.lt.s32.totalorder %s1040_s28, 1  ;;  %vm398_vm1 = vcmask 441344   ;;  %s303_s14 = sand.u32 1, %s963_s25  }
  0x20   : > { %409 = vmatpush.msra.mxu0 %v344_v2  ;;  %v342_v4 = vld [vmem:[#allocation2 + $0xe0] sm:$0xff]  ;;  %v376_v5 = vld [vmem:[#allocation2 + $0x1f0] sm:$0xff]  ;;  %469 = vmatpush.msra.mxu3 %v345_v11  ;;  %v343_v14 = vld [vmem:[#allocation2 + $0xe8] sm:$0xff]  ;;  %vm657_vm6 = vcmask 523264  }
  0x21   : > { %459 = vmatpush.msra.mxu2 %v388_v1  ;;  %429 = vmatpush.msra.mxu1 %v376_v5  ;;  %v340_v6 = vld [vmem:[#allocation2 + $0xd0] sm:$0xff]  ;;  %v374_v8 = vld [vmem:[#allocation2 + $0x1e0] sm:$0xff]  ;;  %v341_v18 = vld [vmem:[#allocation2 + $0xd8] sm:$0xff]  ;;  %s1097_s13 = scalar_select %p306_p13, %s1040_s28, 1 }
  0x22   : > { %v384_v7 = vld [vmem:[#allocation2 + $0x230] sm:$0xff]  ;;  %410 = vmatpush.msra.mxu0 %v342_v4  ;;  %v338_v9 = vld [vmem:[#allocation2 + $0xc0] sm:$0xff]  ;;  %470 = vmatpush.msra.mxu3 %v343_v14  ;;  %v339_v20 = vld [vmem:[#allocation2 + $0xc8] sm:$0xff] }
  0x23   : > { %460 = vmatpush.msra.mxu2 %v386_v3  ;;  %430 = vmatpush.msra.mxu1 %v374_v8  ;;  %v372_v10 = vld [vmem:[#allocation2 + $0x1d0] sm:$0xff]  ;;  %v382_v12 = vld [vmem:[#allocation2 + $0x220] sm:$0xff]  ;;  %v377_v23 = vld [vmem:[#allocation2 + $0x1f8] sm:$0xff]  ;;  %s774_s15 = smul.u32 24, %s1097_s13  ;;  %s764_s13 = sshll.u32 %s303_s14, 3 }
  0x24   : > { %411 = vmatpush.msra.mxu0 %v340_v6  ;;  %v370_v13 = vld [vmem:[#allocation2 + $0x1c0] sm:$0xff]  ;;  %v336_v15 = vld [vmem:[#allocation2 + $0xb0] sm:$0xff]  ;;  %471 = vmatpush.msra.mxu3 %v341_v18  ;;  %v337_v26 = vld [vmem:[#allocation2 + $0xb8] sm:$0xff]  ;;  %s305_s21 = scalar_lea.vmem [#allocation7], %s764_s13  ;;  %s921_s13 = scalar_lea.hbm %s1206_s7, 16 }
  0x25   : > { %461 = vmatpush.msra.mxu2 %v384_v7  ;;  %431 = vmatpush.msra.mxu1 %v372_v10  ;;  %v380_v16 = vld [vmem:[#allocation2 + $0x210] sm:$0xff]  ;;  %v334_v19 = vld [vmem:[#allocation2 + $0xa0] sm:$0xff]  ;;  %v375_v27 = vld [vmem:[#allocation2 + $0x1e8] sm:$0xff]  ;;  %s310_s18 = scalar_lea.vmem %s1199_s0, %s774_s15  ;;  %s771_s15 = sshll.u32 %s1040_s28, 3 }
  0x26   : > { %412 = vmatpush.msra.mxu0 %v338_v9  ;;  %v368_v17 = vld [vmem:[#allocation2 + $0x1b0] sm:$0xff]  ;;  %v378_v21 = vld [vmem:[#allocation2 + $0x200] sm:$0xff]  ;;  %472 = vmatpush.msra.mxu3 %v339_v20  ;;  %v335_v30 = vld [vmem:[#allocation2 + $0xa8] sm:$0xff]  ;;  %s670_s20 = scalar_lea.hbm %s1206_s7, %s771_s15  ;;  %s672_s22 = sshll.u32 %s305_s21, 4  ;;  %s673_s22 = int_to_ptr.vmem [resolvable:$true] %s672_s22 }
  0x27   : > { %462 = vmatpush.msra.mxu2 %v382_v12  ;;  %432 = vmatpush.msra.mxu1 %v370_v13  ;;  %v366_v22 = vld [vmem:[#allocation2 + $0x1a0] sm:$0xff]  ;;  %v332_v24 = vld [vmem:[#allocation2 + $0x90] sm:$0xff]  ;;  %v373_v31 = vld [vmem:[#allocation2 + $0x1d8] sm:$0xff]  ;;  %s674_s23 = sshll.u32 %s670_s20, 4  ;;  %s660_s28 = scalar_lea.sflag [#allocation4], %s303_s14  ;;  %s675_s23 = int_to_ptr.hbm [resolvable:$true] %s674_s23 }
  0x28   : > { %413 = vmatpush.msra.mxu0 %v336_v15  ;;  %v364_v25 = vld [vmem:[#allocation2 + $0x190] sm:$0xff]  ;;  %v330_v28 = vld [vmem:[#allocation2 + $0x80] sm:$0xff]  ;;  %473 = vmatpush.msra.mxu3 %v337_v26  ;;  %v333_v34 = vld [vmem:[#allocation2 + $0x98] sm:$0xff]  ;;  %s915_s29 = sshra.s32 %s675_s23, 4  ;;  %s916_s29 = int_to_ptr.hbm [resolvable:$true] %s915_s29 }
  0x29   : > { %463 = vmatpush.msra.mxu2 %v380_v16  ;;  %433 = vmatpush.msra.mxu1 %v368_v17  ;;  %v362_v29 = vld [vmem:[#allocation2 + $0x180] sm:$0xff]  ;;  %v328_v32 = vld [vmem:[#allocation2 + $0x70] sm:$0xff]  ;;  %v371_v35 = vld [vmem:[#allocation2 + $0x1c8] sm:$0xff]  ;;  %s917_s8 = scalar_lea.hbm %s916_s29, 8  ;;  %p922_p3 = scmp.lt.s32.totalorder %s916_s29, %s1206_s7 }
  0x2a   : > { %414 = vmatpush.msra.mxu0 %v334_v19  ;;  %v360_v33 = vld [vmem:[#allocation2 + $0x170] sm:$0xff]  ;;  %474 = vmatpush.msra.mxu3 %v335_v30  ;;  %v326_v36 = vld [vmem:[#allocation2 + $0x60] sm:$0xff]  ;;  %v331_v38 = vld [vmem:[#allocation2 + $0x88] sm:$0xff]  ;;  %p918_p0 = scmp.ne.s32.totalorder %s916_s29, %s917_s8  ;;  %p923_p4 = scmp.lt.s32.totalorder %s921_s13, %s917_s8 }
  0x2b   : > { %464 = vmatpush.msra.mxu2 %v378_v21  ;;  %434 = vmatpush.msra.mxu1 %v366_v22  ;;  %v358_v37 = vld [vmem:[#allocation2 + $0x160] sm:$0xff]  ;;  %v369_v39 = vld [vmem:[#allocation2 + $0x1b8] sm:$0xff]  ;;  %v324_v40 = vld [vmem:[#allocation2 + $0x50] sm:$0xff] }
  0x2c   : > { %415 = vmatpush.msra.mxu0 %v332_v24  ;;  %475 = vmatpush.msra.mxu3 %v333_v34  ;;  %v356_v41 = vld [vmem:[#allocation2 + $0x150] sm:$0xff]  ;;  %v329_v42 = vld [vmem:[#allocation2 + $0x78] sm:$0xff]  ;;  %v367_v43 = vld [vmem:[#allocation2 + $0x1a8] sm:$0xff]  ;;  %p919_p1 = pnand %p918_p0, %p1057_p5  ;;  %p924_p7 = por %p923_p4, %p922_p3 }
  0x2d   : > { %489 = vmatpush.msrb.mxu2 %v377_v23  ;;  %435 = vmatpush.msra.mxu1 %v364_v25  ;;  %v322_v44 = vld [vmem:[#allocation2 + $0x40] sm:$0xff]  ;;  %v327_v46 = vld [vmem:[#allocation2 + $0x68] sm:$0xff]  ;;  %v365_v47 = vld [vmem:[#allocation2 + $0x198] sm:$0xff] }
  0x2e   : > { %416 = vmatpush.msra.mxu0 %v330_v28  ;;  %476 = vmatpush.msra.mxu3 %v331_v38  ;;  %v354_v45 = vld [vmem:[#allocation2 + $0x140] sm:$0xff]  ;;  %v320_v48 = vld [vmem:[#allocation2 + $0x30] sm:$0xff]  ;;  %v325_v50 = vld [vmem:[#allocation2 + $0x58] sm:$0xff]  ;;  %p920_p2 = pneg %p919_p1 }
  0x2f   : > { %490 = vmatpush.msrb.mxu2 %v375_v27  ;;  %436 = vmatpush.msra.mxu1 %v362_v29  ;;  %v352_v49 = vld [vmem:[#allocation2 + $0x130] sm:$0xff]  ;;  %v363_v51 = vld [vmem:[#allocation2 + $0x188] sm:$0xff]  ;;  %v318_v52 = vld [vmem:[#allocation2 + $0x20] sm:$0xff] }
  0x30   : > { %417 = vmatpush.msra.mxu0 %v328_v32  ;;  %477 = vmatpush.msra.mxu3 %v329_v42  ;;  %v350_v53 = vld [vmem:[#allocation2 + $0x120] sm:$0xff]  ;;  %v323_v54 = vld [vmem:[#allocation2 + $0x48] sm:$0xff]  ;;  %v361_v55 = vld [vmem:[#allocation2 + $0x178] sm:$0xff]  ;;  %p925_p8 = pnand %p924_p7, %p920_p2 }
  0x31   : > { %491 = vmatpush.msrb.mxu2 %v373_v31  ;;  %437 = vmatpush.msra.mxu1 %v360_v33  ;;  %v316_v56 = vld [vmem:[#allocation2 + $0x10] sm:$0xff]  ;;  %v359_v59 = vld [vmem:[#allocation2 + $0x168] sm:$0xff]  ;;  %v314_v60 = vld [vmem:[#allocation2] sm:$0xff] }
  0x32   : > { %418 = vmatpush.msra.mxu0 %v326_v36  ;;  %478 = vmatpush.msra.mxu3 %v327_v46  ;;  %v1103_v57 = vld [vmem:[%s310_s18 + $0x10] sm:$0xff]  ;;  %v321_v61 = vld [vmem:[#allocation2 + $0x38] sm:$0xff]  ;;  %v311_v62 = vld [vmem:[%s310_s18] sm:$0xff] }
  0x33   : > { %492 = vmatpush.msrb.mxu2 %v371_v35  ;;  %438 = vmatpush.msra.mxu1 %v358_v37  ;;  %v348_v58 = vld [vmem:[#allocation2 + $0x110] sm:$0xff]  ;;  %v357_v63 = vld [vmem:[#allocation2 + $0x158] sm:$0xff]  ;;  %v346_v0 = vld [vmem:[#allocation2 + $0x100] sm:$0xff] }
  0x34   : > { %419 = vmatpush.msra.mxu0 %v324_v40  ;;  %479 = vmatpush.msra.mxu3 %v325_v50  ;;  %v319_v1 = vld [vmem:[#allocation2 + $0x28] sm:$0xff]  ;;  %v317_v5 = vld [vmem:[#allocation2 + $0x18] sm:$0xff]  ;;  %v549_v7 = vld [vmem:[#allocation5 + $0x70] sm:$0xff] }
  0x35   : > { %493 = vmatpush.msrb.mxu2 %v369_v39  ;;  %439 = vmatpush.msra.mxu1 %v356_v41  ;;  %v312_v2 = vld [vmem:[%s310_s18 + $0x8] sm:$0xff]  ;;  %v353_v6 = vld [vmem:[#allocation2 + $0x138] sm:$0xff]  ;;  %v547_v13 = vld [vmem:[#allocation5 + $0x60] sm:$0xff] }
  0x36   : > { %420 = vmatpush.msra.mxu0 %v322_v44  ;;  %480 = vmatpush.msra.mxu3 %v323_v54  ;;  %v355_v3 = vld [vmem:[#allocation2 + $0x148] sm:$0xff]  ;;  %v548_v10 = vld [vmem:[#allocation5 + $0x68] sm:$0xff]  ;;  %v565_v14 = vld [vmem:[#allocation5 + $0xf0] sm:$0xff] }
  0x37   : > { %494 = vmatpush.msrb.mxu2 %v367_v43  ;;  %440 = vmatpush.msra.mxu1 %v354_v45  ;;  %v550_v4 = vld [vmem:[#allocation5 + $0x78] sm:$0xff]  ;;  %v349_v12 = vld [vmem:[#allocation2 + $0x118] sm:$0xff]  ;;  %v545_v19 = vld [vmem:[#allocation5 + $0x50] sm:$0xff] }
  0x38   : > { %421 = vmatpush.msra.mxu0 %v320_v48  ;;  %767 = vmatmul.msk.f32.vlgmr.msra.gmra.mxu2 %vm398_vm1, %v1103_v57  ;;  %v315_v8 = vld [vmem:[#allocation2 + $0x8] sm:$0xff]  ;;  %v389_v18 = vld [vmem:[#allocation2 + $0x258] sm:$0xff]  ;;  %v543_v23 = vld [vmem:[#allocation5 + $0x40] sm:$0xff] }
  0x39   : > { %495 = vmatpush.msrb.mxu2 %v365_v47  ;;  %441 = vmatpush.msra.mxu1 %v352_v49  ;;  %v351_v9 = vld [vmem:[#allocation2 + $0x128] sm:$0xff]  ;;  %v544_v21 = vld [vmem:[#allocation5 + $0x48] sm:$0xff]  ;;  %v541_v27 = vld [vmem:[#allocation5 + $0x30] sm:$0xff] }
  0x3a   : > { %422 = vmatpush.msra.mxu0 %v318_v52  ;;  %481 = vmatpush.msra.mxu3 %v321_v61  ;;  %v566_v11 = vld [vmem:[#allocation5 + $0xf8] sm:$0xff]  ;;  %v385_v22 = vld [vmem:[#allocation2 + $0x238] sm:$0xff]  ;;  %v539_v30 = vld [vmem:[#allocation5 + $0x20] sm:$0xff] }
  0x3b   : > { %496 = vmatpush.msrb.mxu2 %v363_v51  ;;  %442 = vmatpush.msra.mxu1 %v350_v53  ;;  %v347_v15 = vld [vmem:[#allocation2 + $0x108] sm:$0xff]  ;;  %v381_v26 = vld [vmem:[#allocation2 + $0x218] sm:$0xff]  ;;  %v563_v33 = vld [vmem:[#allocation5 + $0xe0] sm:$0xff] }
  0x3c   : > { %423 = vmatpush.msra.mxu0 %v316_v56  ;;  %482 = vmatpush.msra.mxu3 %v319_v1  ;;  %v391_v16 = vld [vmem:[#allocation2 + $0x268] sm:$0x3f]  ;;  %v540_v29 = vld [vmem:[#allocation5 + $0x28] sm:$0xff]  ;;  %v537_v34 = vld [vmem:[#allocation5 + $0x10] sm:$0xff] }
  0x3d   : > { %497 = vmatpush.msrb.mxu2 %v361_v55  ;;  %443 = vmatpush.msra.mxu1 %v348_v58  ;;  %v546_v17 = vld [vmem:[#allocation5 + $0x58] sm:$0xff]  ;;  %v564_v31 = vld [vmem:[#allocation5 + $0xe8] sm:$0xff]  ;;  %v561_v37 = vld [vmem:[#allocation5 + $0xd0] sm:$0xff] }
  0x3e   : > { %424 = vmatpush.msra.mxu0 %v314_v60  ;;  %483 = vmatpush.msra.mxu3 %v317_v5  ;;  %v387_v20 = vld [vmem:[#allocation2 + $0x248] sm:$0xff]  ;;  %v536_v36 = vld [vmem:[#allocation5 + $0x8] sm:$0xff]  ;;  %v535_v38 = vld [vmem:[#allocation5] sm:$0xff] }
  0x3f   : > { %498 = vmatpush.msrb.mxu2 %v359_v59  ;;  %425 = vmatmul.f32.vlgmr.msra.gmra.mxu0 %v311_v62  ;;  %v383_v24 = vld [vmem:[#allocation2 + $0x228] sm:$0xff]  ;;  %v560_v39 = vld [vmem:[#allocation5 + $0xc8] sm:$0xff]  ;;  %v559_v40 = vld [vmem:[#allocation5 + $0xc0] sm:$0xff] }
  0x40   : > { %444 = vmatpush.msra.mxu1 %v346_v0  ;;  %484 = vmatpush.msra.mxu3 %v315_v8  ;;  %v542_v25 = vld [vmem:[#allocation5 + $0x38] sm:$0xff]  ;;  %v557_v42 = vld [vmem:[#allocation5 + $0xb0] sm:$0xff]  ;;  %v556_v43 = vld [vmem:[#allocation5 + $0xa8] sm:$0xff] }
  0x41   : > { %499 = vmatpush.msrb.mxu2 %v357_v63  ;;  %445 = vmatmul.f32.vlgmr.msra.gmra.mxu1 %v312_v2  ;;  %v379_v28 = vld [vmem:[#allocation2 + $0x208] sm:$0xff]  ;;  %v555_v44 = vld [vmem:[#allocation5 + $0xa0] sm:$0xff]  ;;  %v392_v46 = vld [vmem:[%s1201_s2] sm:$0x3] }
  0x42   : > { %571 = vmatpush.msrb.mxu1 %v550_v4  ;;  %485 = vmatmul.f32.vlgmr.msra.gmra.mxu3 %v311_v62  ;;  %v538_v32 = vld [vmem:[#allocation5 + $0x18] sm:$0xff]  ;;  %v394_v47 = vperm.slane %v392_v46, 0  ;;  %v553_v48 = vld [vmem:[#allocation5 + $0x90] sm:$0xff]  ;;  %v552_v51 = vld [vmem:[#allocation5 + $0x88] sm:$0xff]  ;;  %v395_v61 = vperm.slane %v392_v46, 1 }
  0x43   : > { %500 = vmatpush.msrb.mxu2 %v355_v3  ;;  %591 = vmatpush.msrb.mxu3 %v566_v11  ;;  %v562_v35 = vld [vmem:[#allocation5 + $0xd8] sm:$0xff]  ;;  %v551_v53 = vld [vmem:[#allocation5 + $0x80] sm:$0xff]  ;;  %v625_v8 = vld [vmem:[%s1204_s5 + $0x58] sm:$0xff] }
  0x44   : > { %572 = vmatpush.msrb.mxu1 %v549_v7  ;;  %v558_v41 = vld [vmem:[#allocation5 + $0xb8] sm:$0xff]  ;;  %v628_v5 = vld [vmem:[%s1204_s5 + $0x70] sm:$0xff]  ;;  %v626_v7 = vld [vmem:[%s1204_s5 + $0x60] sm:$0xff] }
  0x45   : > { %501 = vmatpush.msrb.mxu2 %v353_v6  ;;  %592 = vmatpush.msrb.mxu3 %v565_v14  ;;  %v554_v45 = vld [vmem:[#allocation5 + $0x98] sm:$0xff]  ;;  %v622_v11 = vld [vmem:[%s1204_s5 + $0x40] sm:$0xff] }
  0x46   : > { %573 = vmatpush.msrb.mxu1 %v548_v10  ;;  %v627_v6 = vld [vmem:[%s1204_s5 + $0x68] sm:$0xff] }
  0x47   : > { %502 = vmatpush.msrb.mxu2 %v351_v9  ;;  %593 = vmatpush.msrb.mxu3 %v564_v31  ;;  %v624_v9 = vld [vmem:[%s1204_s5 + $0x50] sm:$0xff]  ;;  %v623_v10 = vld [vmem:[%s1204_s5 + $0x48] sm:$0xff] }
  0x48   : > { %574 = vmatpush.msrb.mxu1 %v547_v13  ;;  %v620_v13 = vld [vmem:[%s1204_s5 + $0x30] sm:$0xff]  ;;  %v619_v14 = vld [vmem:[%s1204_s5 + $0x28] sm:$0xff] }
  0x49   : > { %503 = vmatpush.msrb.mxu2 %v349_v12  ;;  %594 = vmatpush.msrb.mxu3 %v563_v33  ;;  %v621_v12 = vld [vmem:[%s1204_s5 + $0x38] sm:$0xff] }
  0x4a   : > { %575 = vmatpush.msrb.mxu1 %v546_v17  ;;  %v616_v17 = vld [vmem:[%s1204_s5 + $0x10] sm:$0xff] }
  0x4b   : > { %504 = vmatpush.msrb.mxu2 %v347_v15  ;;  %595 = vmatpush.msrb.mxu3 %v562_v35  ;;  %v618_v15 = vld [vmem:[%s1204_s5 + $0x20] sm:$0xff] }
  0x4c   : > { %505 = vmatmul.f32.vlgmr.msrb.gmra.mxu2 %v312_v2  ;;  %576 = vmatpush.msrb.mxu1 %v545_v19  ;;  %v614_v19 = vld [vmem:[%s1204_s5] sm:$0xff] }
  0x4d   : > { %768 = vmatpush.msk.msra.mxu2 %vm402_vm0, %v391_v16  ;;  %596 = vmatpush.msrb.mxu3 %v561_v37  ;;  %v617_v16 = vld [vmem:[%s1204_s5 + $0x18] sm:$0xff] }
  0x4e   : > { %577 = vmatpush.msrb.mxu1 %v544_v21 }
  0x4f   : > { %519 = vmatpush.msra.mxu2 %v389_v18  ;;  %597 = vmatpush.msrb.mxu3 %v560_v39  ;;  %v615_v18 = vld [vmem:[%s1204_s5 + $0x8] sm:$0xff] }
  0x50   : > { %578 = vmatpush.msrb.mxu1 %v543_v23 }
  0x51   : > { %520 = vmatpush.msra.mxu2 %v387_v20  ;;  %598 = vmatpush.msrb.mxu3 %v559_v40  ;;  %v839_v20 = vld [vmem:[%s1203_s4] ss:$0 sm:$0xff] }
  0x52   : > { %579 = vmatpush.msrb.mxu1 %v542_v25 }
  0x53   : > { %521 = vmatpush.msra.mxu2 %v385_v22  ;;  %599 = vmatpush.msrb.mxu3 %v558_v41 }
  0x54   : > { %580 = vmatpush.msrb.mxu1 %v541_v27  ;;  %v840_v27 = vld [vmem:[%s1205_s6] ss:$0 sm:$0xff] }
  0x55   : > { %522 = vmatpush.msra.mxu2 %v383_v24  ;;  %600 = vmatpush.msrb.mxu3 %v557_v42 }
  0x56   : > { %581 = vmatpush.msrb.mxu1 %v540_v29 }
  0x57   : > { %523 = vmatpush.msra.mxu2 %v381_v26  ;;  %601 = vmatpush.msrb.mxu3 %v556_v43 }
  0x58   : > { %582 = vmatpush.msrb.mxu1 %v539_v30 }
  0x59   : > { %524 = vmatpush.msra.mxu2 %v379_v28  ;;  %602 = vmatpush.msrb.mxu3 %v555_v44 }
  0x5a   : > { %769 = vmatmul.msk.f32.vlgmr.msra.gmra.mxu2 %vm398_vm1, %v1103_v57  ;;  %583 = vmatpush.msrb.mxu1 %v538_v32  ;;  %v629_v57 = vld [vmem:[%s1204_s5 + $0x78] sm:$0xff] }
  0x5b   : > { %603 = vmatpush.msrb.mxu3 %v554_v45  ;;  %634 = vmatpush.msrb.mxu0 %v629_v57 }
  0x5c   : > { %584 = vmatpush.msrb.mxu1 %v537_v34 }
  0x5d   : > { %604 = vmatpush.msrb.mxu3 %v553_v48  ;;  %635 = vmatpush.msrb.mxu0 %v628_v5 }
  0x5e   : > { %585 = vmatpush.msrb.mxu1 %v536_v36 }
  0x5f   : > { %605 = vmatpush.msrb.mxu3 %v552_v51  ;;  %636 = vmatpush.msrb.mxu0 %v627_v6 }
  0x60   : > { %586 = vmatpush.msrb.mxu1 %v535_v38 }
  0x61   : > { %606 = vmatpush.msrb.mxu3 %v551_v53  ;;  %637 = vmatpush.msrb.mxu0 %v626_v7 }
  0x63   : > { %638 = vmatpush.msrb.mxu0 %v625_v8 }
  0x65   : > { %639 = vmatpush.msrb.mxu0 %v624_v9 }
  0x67   : > { %640 = vmatpush.msrb.mxu0 %v623_v10 }
  0x69   : > { %641 = vmatpush.msrb.mxu0 %v622_v11 }
  0x6b   : > { %642 = vmatpush.msrb.mxu0 %v621_v12 }
  0x6d   : > { %643 = vmatpush.msrb.mxu0 %v620_v13 }
  0x6f   : > { %644 = vmatpush.msrb.mxu0 %v619_v14 }
  0x71   : > { %645 = vmatpush.msrb.mxu0 %v618_v15 }
  0x73   : > { %646 = vmatpush.msrb.mxu0 %v617_v16 }
  0x75   : > { %647 = vmatpush.msrb.mxu0 %v616_v17 }
  0x77   : > { %648 = vmatpush.msrb.mxu0 %v615_v18 }
  0x79   : > { %649 = vmatpush.msrb.mxu0 %v614_v19 }
  0xbb   : > { %v466_v55 = vpop.f32.mrf.mxu2 }
  0xbc   : > { %v426_v49 = vpop.f32.mrf.mxu0 }
  0xbd   : > { %v427_v50 = vadd.f32 %v426_v49, %v394_v47 }
  0xbe   : > { %v446_v52 = vpop.f32.mrf.mxu1 }
  0xbf   : > { %v447_v54 = vadd.f32 %v446_v52, %v427_v50 }
  0xc1   : > { %v467_v56 = vadd.f32 %v466_v55, %v447_v54 }
  0xc3   : > { %v531_v58 = vmul.f32 0.01, %v467_v56  ;;  %vm529_vm2 = vcmp.gt.f32.partialorder %v467_v56, 0.0 }
  0xc5   : > { %v533_v59 = vsel %vm529_vm2, %v467_v56, %v531_v58  ;;  %v486_v62 = vpop.f32.mrf.mxu3 }
  0xc6   : > { %587 = vmatmul.f32.vlgmr.msrb.gmra.mxu1 %v533_v59  ;;  %v487_v63 = vadd.f32 %v486_v62, %v395_v61 }
  0xcf   : > { %v506_v60 = vpop.f32.mrf.mxu2 }
  0xd0   : > { %v507_v0 = vadd.f32 %v506_v60, %v487_v63 }
  0xdd   : > { %v526_v1 = vpop.f32.mrf.mxu2 }
  0xde   : > { %v527_v2 = vadd.f32 %v526_v1, %v507_v0 }
  0xe0   : > { %v532_v3 = vmul.f32 0.01, %v527_v2  ;;  %vm530_vm3 = vcmp.gt.f32.partialorder %v527_v2, 0.0 }
  0xe2   : > { %v534_v4 = vsel %vm530_vm3, %v527_v2, %v532_v3 }
  0xe3   : > { %607 = vmatmul.f32.vlgmr.msrb.gmra.mxu3 %v534_v4 }
 0x143   : > { %v588_v21 = vpop.f32.mrf.mxu1 }
 0x144   : > { %v589_v22 = vadd.f32 %v839_v20, %v588_v21 }
 0x166   : > { %v608_v23 = vpop.f32.mrf.mxu3 }
 0x167   : > { %v609_v24 = vadd.f32 %v608_v23, %v589_v22 }
 0x169   : > { %v612_v25 = vmul.f32 0.01, %v609_v24  ;;  %vm611_vm4 = vcmp.gt.f32.partialorder %v609_v24, 0.0 }
 0x16b   : > { %v613_v26 = vsel %vm611_vm4, %v609_v24, %v612_v25 }
 0x16c   : > { %650 = vmatmul.f32.vlgmr.msrb.gmra.mxu0 %v613_v26 }
 0x1e9   : > { %v651_v28 = vpop.f32.mrf.mxu0 }
 0x1ea   : > { %v652_v29 = vadd.f32 %v840_v27, %v651_v28 }
 0x1ec   : > { %vm654_vm5 = vcmp.gt.f32.partialorder %v652_v29, 0.0  ;;  %v655_v30 = vmul.f32 0.01, %v652_v29 }
 0x1ee   : > { %v656_v31 = vsel %vm654_vm5, %v652_v29, %v655_v30 }
 0x1ef   : > { %658 = vst.msk [vmem:[%s305_s21] sm:$0xff] %vm657_vm6, %v656_v31 }
 0x1f0   : > { %928 = shalt.err (!%p925_p8)
}
 0x1f1   : > { %783 = dma.vmem_to_hbm [thread:$0]  (%p1057_p5), %s673_s22, 128, %s675_s23, %s660_s28  }
 0x1f2 PF: > { %p800_p9 = scmp.ge.s32.totalorder %s971_s27, 2  ;;  %s686_s14 = sand.u32 1, %s959_s24  }
 0x1f3   : > { %s687_s18 = scalar_lea.sflag [#allocation4], %s686_s14 }
 0x1f4   : > { %p793_p10 = pnand %p800_p9, %p1061_p6 }
 0x1f6   : > { %p794_p11 = pneg %p793_p10 }
 0x1f8   : > { %954 = dma.done.wait (%p794_p11), %s687_s18, 128  }
 0x1f9   : > { %956 = vsyncadd (%p794_p11), %s687_s18, 4294967168  ;;  %p19_p12 = scmp.ge.s32.totalorder %s1044_s30, 4   ;;  %s1210_s24 = smov %s963_s25 }
 0x1fa   : > { %s1211_s25 = smov %s967_s26  ;;  %s1212_s26 = smov %s1055_s10 }
 0x1fb   : > { %s1213_s27 = smov %s1044_s30  ;;  %21 = sbr.rel (!%p19_p12) target bundleno = 5 (0x5), region = 92 }
 0x200   :  { %693 = vsyncpa [#allocation3], 1 }
 0x201   :  { %695 = vsyncpa [#allocation3 + $0x1], 1 }
 0x202   :  { %696 = vsyncpa [#allocation6], 1 }
 0x203   :  { %697 = vsyncpa [#allocation4], 1 }
 0x204   :  { %699 = vsyncpa [#allocation4 + $0x1], 1 }

</bundles_post_ra>
